<compile_context>
chip_gen: v7x
topology: tpu7x:2x2x1
jax: 0.10.0
libtpu: 0.0.40
codegen_flags: <defaults>
</compile_context>

<pallas_src>
import functools

import jax
import jax.numpy as jnp
from jax.experimental import pallas as pl
from jax.experimental.pallas import tpu as pltpu


def _round_up(x, m):
    return ((x + m - 1) // m) * m


def _pick_tile(padded, candidates=(512, 384, 256, 128)):
    """Largest candidate tile that divides `padded` (padded is a multiple of 128)."""
    if padded <= candidates[0]:
        return padded
    for c in candidates:
        if padded % c == 0:
            return c
    return 128


def _nc_tiling(in_dim, num_classes):
    """Padded sizes and tile sizes for the (K, N) = (in_dim, num_classes) dims."""
    Dp = _round_up(in_dim, 128)
    Cp = _round_up(num_classes, 128)
    tk = _pick_tile(Dp)          # == Dp when Dp <= 512  -> K axis collapses
    tn = _pick_tile(Cp)          # lane-dense output tile (multiple of 128)
    return Dp, Cp, tk, tn


# ----------------------------------------------------------------------------
# Kernels
# ----------------------------------------------------------------------------
def _linear_bias_kernel(x_ref, w_ref, b_ref, o_ref):
    """Single-shot tile: whole reduction dim in one MXU call, bias added inline."""
    o_ref[...] = jnp.broadcast_to(b_ref[...], o_ref.shape) + jnp.dot(
        x_ref[...], w_ref[...], preferred_element_type=jnp.float32
    )


def _linear_bias_acc_kernel(x_ref, w_ref, b_ref, o_ref):
    """K-tiled variant: accumulate directly into the f32 output tile."""
    k = pl.program_id(2)

    @pl.when(k == 0)
    def _():
        # Fold the bias add into the accumulator (output-tile) init.
        o_ref[...] = jnp.broadcast_to(b_ref[...], o_ref.shape).astype(jnp.float32)

    o_ref[...] += jnp.dot(x_ref[...], w_ref[...], preferred_element_type=jnp.float32)


# ----------------------------------------------------------------------------
# Parameter preparation (call ONCE at load time, not per forward call)
# ----------------------------------------------------------------------------
def prepare_classification_head_params(weight, bias, param_dtype=jnp.bfloat16):
    """Transpose / pad / cast nn.Linear params for the kernel.

    weight: (C, D) f32 (PyTorch nn.Linear layout: out_features x in_features)
    bias:   (C,)   f32
    returns w_p: (Dp, Cp) param_dtype, b_p: (1, Cp) f32
    """
    C, D = weight.shape
    Dp, Cp, _, _ = _nc_tiling(D, C)
    w_p = jnp.pad(weight.T, ((0, Dp - D), (0, Cp - C))).astype(param_dtype)
    b_p = jnp.pad(bias, (0, Cp - C)).reshape(1, Cp).astype(jnp.float32)
    return w_p, b_p


# ----------------------------------------------------------------------------
# Forward pass
# ----------------------------------------------------------------------------
@functools.partial(jax.jit, static_argnames=("num_classes", "in_dim"))
def classification_head_apply(x, w_p, b_p, *, num_classes, in_dim):
    """y = x @ W^T + b using pre-prepared (transposed / padded / bf16) params.

    x:   (B, in_dim) f32
    w_p: (Dp, Cp)    bf16   (from prepare_classification_head_params)
    b_p: (1, Cp)     f32
    returns (B, num_classes) f32
    """
    B, D = x.shape
    assert D == in_dim
    Dp, Cp = w_p.shape
    _, _, tk, tn = _nc_tiling(in_dim, num_classes)

    # M tiling: minimal padding for small batches, up to 256 rows per tile.
    tm = min(256, _round_up(B, 8))
    Mp = _round_up(B, tm)

    # Pad + cast activations to the MXU operand dtype.
    x_p = jnp.pad(x, ((0, Mp - B), (0, Dp - D))).astype(w_p.dtype)

    n_k = Dp // tk

    if n_k == 1:
        grid = (Mp // tm, Cp // tn)
        in_specs = [
            pl.BlockSpec((tm, Dp), lambda i, j: (i, 0)),   # x tile (full K)
            pl.BlockSpec((Dp, tn), lambda i, j: (0, j)),   # W^T tile (full K)
            pl.BlockSpec((1, tn), lambda i, j: (0, j)),    # bias tile
        ]
        out_specs = pl.BlockSpec((tm, tn), lambda i, j: (i, j))
        kernel = _linear_bias_kernel
        dims = ("parallel", "parallel")
    else:
        grid = (Mp // tm, Cp // tn, n_k)
        in_specs = [
            pl.BlockSpec((tm, tk), lambda i, j, k: (i, k)),   # x tile
            pl.BlockSpec((tk, tn), lambda i, j, k: (k, j)),   # W^T tile
            pl.BlockSpec((1, tn), lambda i, j, k: (0, j)),    # bias tile
        ]
        out_specs = pl.BlockSpec((tm, tn), lambda i, j, k: (i, j))
        kernel = _linear_bias_acc_kernel
        dims = ("parallel", "parallel", "arbitrary")

    # VMEM budget derived from the actual tile footprint (double-buffered),
    # capped well below v7x's 64 MiB per-TensorCore VMEM.
    itemsize = jnp.dtype(w_p.dtype).itemsize
    bytes_per_step = (tm * tk + tk * tn) * itemsize + tn * 4 + tm * tn * 4
    vmem_limit = int(min(48 * 1024 * 1024, max(16 * 1024 * 1024, 4 * bytes_per_step)))

    cost = pl.CostEstimate(
        flops=2 * Mp * Cp * Dp,
        transcendentals=0,
        bytes_accessed=int(
            x_p.size * itemsize + w_p.size * itemsize + b_p.size * 4 + Mp * Cp * 4
        ),
    )

    out_padded = pl.pallas_call(
        kernel,
        out_shape=jax.ShapeDtypeStruct((Mp, Cp), jnp.float32),
        grid_spec=pltpu.PrefetchScalarGridSpec(
            num_scalar_prefetch=0,
            grid=grid,
            in_specs=in_specs,
            out_specs=out_specs,
        ),
        compiler_params=pltpu.CompilerParams(
            dimension_semantics=dims,
            vmem_limit_bytes=vmem_limit,
        ),
        cost_estimate=cost,
    )(x_p, w_p, b_p)

    # NOTE: for large heads feeding a softmax/argmax, prefer returning the
    # padded (B, Cp) logits and masking downstream instead of slicing here.
    return out_padded[:B, :num_classes]


def classification_head(x, weight, bias):
    """Convenience wrapper: nn.Linear(in_dim, num_classes) forward.

    In a real model, call prepare_classification_head_params() once at
    parameter-load time and reuse w_p/b_p across steps.
    """
    C, D = weight.shape
    w_p, b_p = prepare_classification_head_params(weight, bias)
    return classification_head_apply(x, w_p, b_p, num_classes=C, in_dim=D)


# ----------------------------------------------------------------------------
# Self-test
# ----------------------------------------------------------------------------
def _check(batch, in_dim, num_classes, key):
    k_x, k_w, k_b = jax.random.split(key, 3)
    bound = 1.0 / (in_dim ** 0.5)
    weight = jax.random.uniform(
        k_w, (num_classes, in_dim), jnp.float32, minval=-bound, maxval=bound
    )
    bias = jax.random.uniform(
        k_b, (num_classes,), jnp.float32, minval=-bound, maxval=bound
    )
    x = jax.random.normal(k_x, (batch, in_dim), jnp.float32)

    out = jax.block_until_ready(classification_head(x, weight, bias))
    assert out.shape == (batch, num_classes)
    assert out.dtype == jnp.float32

    # Exact-math reference for what the kernel computes (bf16 operands, f32 acc).
    x_bf = x.astype(jnp.bfloat16).astype(jnp.float32)
    w_bf = weight.astype(jnp.bfloat16).astype(jnp.float32)
    ref_bf16 = x_bf @ w_bf.T + bias
    assert jnp.allclose(out, ref_bf16, atol=2e-3, rtol=2e-3), "mismatch vs bf16 reference"

    # Loose check against pure-f32 nn.Linear math (bf16 quantization of operands).
    ref_f32 = x @ weight.T + bias
    assert jnp.allclose(out, ref_f32, atol=5e-2, rtol=5e-2), "mismatch vs f32 reference"


if __name__ == "__main__":
    key = jax.random.PRNGKey(0)
    k1, k2 = jax.random.split(key)

    # Literal module shape: batch=8, in_dim=32, num_classes=16 (single-shot path).
    _check(batch=8, in_dim=32, num_classes=16, key=k1)

    # Larger shape exercising padding + the K-accumulation path (Dp > 512).
    _check(batch=64, in_dim=1024, num_classes=384, key=k2)

    print("KERNEL_OK")
</pallas_src>

<mosaic_0001>
module attributes {stable_mosaic.version = 11 : i64} {
  func.func @_linear_bias_kernel(%arg0: i32, %arg1: i32, %arg2: memref<8x128xbf16, #tpu.memory_space<vmem>>, %arg3: memref<128x128xbf16, #tpu.memory_space<vmem>>, %arg4: memref<1x128xf32, #tpu.memory_space<vmem>>, %arg5: memref<8x128xf32, #tpu.memory_space<vmem>>) attributes {dimension_semantics = [#tpu.dimension_semantics<parallel>, #tpu.dimension_semantics<parallel>], iteration_bounds = array<i64: 1, 1>, scalar_prefetch = 0 : i64, scratch_operands = 0 : i64, tpu.core_type = #tpu.core_type<tc>, window_params = [{transform_indices = @transform_0, window_bounds = array<i64: 8, 128>}, {transform_indices = @transform_1, window_bounds = array<i64: 128, 128>}, {transform_indices = @transform_2, window_bounds = array<i64: 1, 128>}, {transform_indices = @transform_3, window_bounds = array<i64: 8, 128>}]} {
    %c0 = arith.constant 0 : index
    %c0_0 = arith.constant 0 : index
    %0 = vector.load %arg4[%c0, %c0_0] : memref<1x128xf32, #tpu.memory_space<vmem>>, vector<1x128xf32>
    %1 = vector.shape_cast %0 : vector<1x128xf32> to vector<1x128xf32>
    %2 = vector.broadcast %1 : vector<1x128xf32> to vector<8x128xf32>
    %c0_1 = arith.constant 0 : index
    %c0_2 = arith.constant 0 : index
    %3 = vector.load %arg2[%c0_1, %c0_2] : memref<8x128xbf16, #tpu.memory_space<vmem>>, vector<8x128xbf16>
    %c0_3 = arith.constant 0 : index
    %c0_4 = arith.constant 0 : index
    %4 = vector.load %arg3[%c0_3, %c0_4] : memref<128x128xbf16, #tpu.memory_space<vmem>>, vector<128x128xbf16>
    %cst = arith.constant dense<0.000000e+00> : vector<8x128xf32>
    %5 = tpu.matmul %3, %4, %cst {dimension_numbers = #tpu.dot_dimension_numbers<[1], [0], [0], [1], [0, 0, 1, 1], [], []>} : vector<8x128xbf16>, vector<128x128xbf16>, vector<8x128xf32> -> vector<8x128xf32>
    %6 = arith.addf %2, %5 : vector<8x128xf32>
    %c0_5 = arith.constant 0 : index
    %c0_6 = arith.constant 0 : index
    %7 = vector.load %arg5[%c0_5, %c0_6] : memref<8x128xf32, #tpu.memory_space<vmem>>, vector<8x128xf32>
    tpu.vector_store %arg5[%c0_5, %c0_6], %6 {strides = array<i32>} : memref<8x128xf32, #tpu.memory_space<vmem>>, vector<8x128xf32>,
    return
  }
  func.func @transform_0(%arg0: i32, %arg1: i32) -> (i32, i32) {
    %c0_i32 = arith.constant 0 : i32
    %c0_i32_0 = arith.constant 0 : i32
    return %arg0, %c0_i32 : i32, i32
  }
  func.func @transform_1(%arg0: i32, %arg1: i32) -> (i32, i32) {
    %c0_i32 = arith.constant 0 : i32
    %c0_i32_0 = arith.constant 0 : i32
    return %c0_i32, %arg1 : i32, i32
  }
  func.func @transform_2(%arg0: i32, %arg1: i32) -> (i32, i32) {
    %c0_i32 = arith.constant 0 : i32
    %c0_i32_0 = arith.constant 0 : i32
    return %c0_i32, %arg1 : i32, i32
  }
  func.func @transform_3(%arg0: i32, %arg1: i32) -> (i32, i32) {
    %c0_i32 = arith.constant 0 : i32
    return %arg0, %arg1 : i32, i32
  }
}

</mosaic_0001>

<bundles_post_ra>
// kernel: classification_head_apply.1
= control target key start
LH: loop header
LB: loop body
LE: loop exit
PB: predicated region body
PF: predicated region fallthrough
CT: control target
= control target key end

     0   :  { %8 = vsyncpa [#allocation3], 0  ;;  %s315_s0 = inlined_call_operand.vmem [shape: bf16[8,128], index: 0, kind: input, shape index: {}]   ;;  %s316_s1 = inlined_call_operand.hbm [shape: bf16[128,128], index: 1, kind: input, shape index: {}]   ;;  %s317_s2 = inlined_call_operand.vmem [shape: f32[1,128], index: 2, kind: input, shape index: {}]   ;;  %s318_s3 = inlined_call_operand.hbm [shape: f32[8,128], index: 3, kind: output, shape index: {}]  }
   0x1   :  { %9 = vsyncpa [#allocation4], 0  ;;  %s259_s12 = smov [#allocation2]   ;;  %s211_s16 = scalar_lea.hbm %s316_s1, 1024 }
   0x2   :  { %s17_s13 = sshll.u32 %s259_s12, 4  ;;  %p212_p0 = scmp.ne.s32.totalorder %s316_s1, %s211_s16  ;;  %s18_s13 = int_to_ptr.vmem [resolvable:$true] %s17_s13 }
   0x3   :  { %p215_p1 = scmp.lt.u32.totalorder %s211_s16, %s316_s1 }
   0x5   :  { %p217_p2 = pnand %p215_p1, %p212_p0 }
   0x7   :  { %220 = shalt.err (!%p217_p2)
}
   0x8   :  { %s221_s21 = scalar_lea.vmem %s18_s13, 1024  ;;  %p226_p4 = scmp.lt.s32.totalorder %s18_s13, %s18_s13 }
   0x9   :  { %p222_p3 = scmp.ne.s32.totalorder %s18_s13, %s221_s21  ;;  %p227_p5 = scmp.lt.s32.totalorder %s221_s21, %s221_s21 }
   0xb   :  { %p228_p6 = por %p227_p5, %p226_p4 }
   0xd   :  { %p229_p7 = pnand %p228_p6, %p222_p3 }
   0xf   :  { %232 = shalt.err (!%p229_p7)
}
  0x10   :  { %s260_s22 = smov 64   ;;  %s261_s23 = smov 4  }
  0x11   :  { %23 = dma.hbm_to_vmem [thread:$0]  %s316_s1, 1024, %s18_s13, [#allocation3], %s260_s22, %s260_s22, %s261_s23  }
  0x12   :  { %255 = dma.done.wait [#allocation3], 1024  }
  0x13   :  { %256 = vsyncadd [#allocation3], 4294966272  ;;  %v262_v0 = vmov 0.0   ;;  %vm263_vm0 = vmmov 0   ;;  %v203_v1 = vld [vmem:[#allocation2] sm:$0xff]   ;;  %v204_v2 = vld [vmem:[#allocation2 + $0x8] sm:$0xff]  }
  0x14   :  { %177 = vmatprep.subr.bf16.mxu0 %v262_v0  ;;  %193 = vmatprep.mubr.msk.bf16.mxu0 %vm263_vm0, %v262_v0  ;;  %v205_v3 = vld [vmem:[#allocation2 + $0x10] sm:$0xff]   ;;  %v206_v4 = vld [vmem:[#allocation2 + $0x18] sm:$0xff]   ;;  %v207_v5 = vld [vmem:[#allocation2 + $0x20] sm:$0xff]   ;;  %s264_s29 = smov [#allocation5]  }
  0x15   :  { %178 = vmatpush3.bf16.msra.mxu0 %v203_v1  ;;  %v208_v6 = vld [vmem:[#allocation2 + $0x28] sm:$0xff]   ;;  %v209_v7 = vld [vmem:[#allocation2 + $0x30] sm:$0xff]   ;;  %v210_v8 = vld [vmem:[#allocation2 + $0x38] sm:$0xff]   ;;  %s150_s30 = sshll.u32 %s264_s29, 4  ;;  %s151_s30 = int_to_ptr.vmem [resolvable:$true] %s150_s30 }
  0x16   :  { %179 = vmatprep.subr.bf16.mxu0 %v262_v0  ;;  %v37_v9 = vld [vmem:[%s315_s0] sm:$0xf]  ;;  %s233_s4 = scalar_lea.vmem %s151_s30, 128  ;;  %p238_p9 = scmp.lt.s32.totalorder %s151_s30, %s151_s30 }
  0x17   :  { %v159_v10 = vld [vmem:[%s317_s2] ss:$0 sm:$0xff]  ;;  %p234_p8 = scmp.ne.s32.totalorder %s151_s30, %s233_s4  ;;  %p239_p10 = scmp.lt.s32.totalorder %s233_s4, %s233_s4 }
  0x19   :  { %180 = vmatpush3.bf16.msra.mxu0 %v204_v2  ;;  %p240_p11 = por %p239_p10, %p238_p9 }
  0x1a   :  { %181 = vmatprep.subr.bf16.mxu0 %v262_v0 }
  0x1b   :  { %p241_p12 = pnand %p240_p11, %p234_p8 }
  0x1d   :  { %182 = vmatpush3.bf16.msra.mxu0 %v205_v3 }
  0x1e   :  { %183 = vmatprep.subr.bf16.mxu0 %v262_v0 }
  0x21   :  { %184 = vmatpush3.bf16.msra.mxu0 %v206_v4 }
  0x22   :  { %185 = vmatprep.subr.bf16.mxu0 %v262_v0 }
  0x25   :  { %186 = vmatpush3.bf16.msra.mxu0 %v207_v5 }
  0x26   :  { %187 = vmatprep.subr.bf16.mxu0 %v262_v0 }
  0x29   :  { %188 = vmatpush3.bf16.msra.mxu0 %v208_v6 }
  0x2a   :  { %189 = vmatprep.subr.bf16.mxu0 %v262_v0 }
  0x2d   :  { %190 = vmatpush3.bf16.msra.mxu0 %v209_v7 }
  0x2e   :  { %191 = vmatprep.subr.bf16.mxu0 %v262_v0 }
  0x31   :  { %192 = vmatpush3.bf16.msra.mxu0 %v210_v8 }
  0x34   :  { %194 = vmatmul.mubr.bf16.vlgmr.msra.gmra.mrb[0].mxu0 %v37_v9 }
 0x107   :  { %v136_v11 = vpop.f32.mrb[0].mxu0 }
 0x108   :  { %v142_v12 = vadd.f32 %v159_v10, %v136_v11  ;;  %v195_v13 = vpop.f32.mrb[1].mxu0 }
 0x109   :  { %v139_v14 = vpop.f32.mrb[2].mxu0 }
 0x10a   :  { %143 = vst [vmem:[#allocation5] sm:$0xff] %v142_v12  ;;  %v196_v15 = vpop.f32.mrb[3].mxu0 }
 0x10b   :  { %244 = shalt.err (!%p241_p12)
}
 0x10c   :  { %s245_s2 = scalar_lea.hbm %s318_s3, 128 }
 0x10d   :  { %p246_p13 = scmp.ne.s32.totalorder %s318_s3, %s245_s2  ;;  %p249_p0 = scmp.lt.u32.totalorder %s245_s2, %s318_s3 }
 0x10f   :  { %p251_p1 = pnand %p249_p0, %p246_p13 }
 0x111   :  { %254 = shalt.err (!%p251_p1)
}
 0x112   :  { %153 = dma.vmem_to_hbm [thread:$0]  %s151_s30, 128, %s318_s3, [#allocation4]  }
 0x113   :  { %257 = dma.done.wait [#allocation4], 128  }
 0x114   :  { %258 = vsyncadd [#allocation4], 4294967168 }
 0x115   :  { %157 = vsyncpa [#allocation3], 1 }
 0x116   :  { %158 = vsyncpa [#allocation4], 1 }

</bundles_post_ra>
